<compile_context>
chip_gen: v6e
topology: v6e:2x2x1
jax: 0.10.0
libtpu: 0.0.40
codegen_flags: <defaults>
</compile_context>

<pallas_src>
import jax
import jax.numpy as jnp
from jax.experimental import pallas as pl
from jax.experimental.pallas import tpu as pltpu

RANGE = (-2, 2)  # default PhaseShuffle range -> roll amount in {-2, -1, 0, 1}


def phase_shuffle_kernel(shift_ref, x_ref, o_ref):
    # shift_ref: SMEM scalar-prefetch ref holding the dynamic roll amount.
    s = shift_ref[0]
    x = x_ref[...]
    T = x.shape[-1]
    out = x  # k == 0 case
    # The shift range is tiny and static: select among static XLU lane rotations.
    # pltpu.roll(x, k, axis) matches np.roll / torch.roll semantics; negative k is
    # folded into a positive rotation amount (k % T) at trace time.
    for k in range(RANGE[0], RANGE[1]):
        if k == 0:
            continue
        out = jnp.where(s == k, pltpu.roll(x, k % T, 1), out)
    o_ref[...] = out


def _pick_tile_rows(rows, t, itemsize, target_bytes=2 * 1024 * 1024):
    """Pick a row-tile size: multiple of the dtype sublane pack, ~2 MiB per block,
    and an exact divisor of `rows` (keeps every store lane/sublane-dense)."""
    pack = 8 * max(1, 4 // itemsize)  # 8 for f32, 16 for bf16/f16, 32 for int8
    if rows <= pack or rows % pack != 0:
        # Full-extent block (always a legal block dim, regardless of (8,128) rule).
        return rows
    bytes_per_row = max(1, t * itemsize)
    max_rows_by_bytes = max(pack, (target_bytes // bytes_per_row) // pack * pack)
    tile = min(rows, max_rows_by_bytes)
    while rows % tile != 0:  # shrink to a divisor so no masked partial blocks
        tile -= pack
    return tile


def phase_shuffle(x, roll_amount):
    """x: (B, C, T); roll_amount: int32 scalar (traced or concrete)."""
    B, C, T = x.shape
    rows = B * C
    x2 = x.reshape(rows, T)

    # Clamp to the module's range so an out-of-range caller value can't silently
    # fall through to the identity branch.
    shift = jnp.clip(
        jnp.asarray(roll_amount, jnp.int32), RANGE[0], RANGE[1] - 1
    ).reshape((1,))

    itemsize = jnp.dtype(x.dtype).itemsize
    tile_r = _pick_tile_rows(rows, T, itemsize)
    grid = (rows // tile_r,)

    # Each row tile is independent -> "parallel" (shards across the two TCs on
    # v7x; neutral on single-TC v5e/v6e).  ~2 MiB tiles keep double-buffered
    # in+out (4x tile) well under the default scoped-VMEM limit on every gen
    # (16 MiB v5e / 32 MiB v6e / 32-of-64 MiB v7x); vmem_limit_bytes adds headroom.
    out2 = pl.pallas_call(
        phase_shuffle_kernel,
        out_shape=jax.ShapeDtypeStruct((rows, T), x.dtype),
        grid_spec=pltpu.PrefetchScalarGridSpec(
            num_scalar_prefetch=1,
            grid=grid,
            in_specs=[pl.BlockSpec((tile_r, T), lambda i, s_ref: (i, 0))],
            out_specs=pl.BlockSpec((tile_r, T), lambda i, s_ref: (i, 0)),
        ),
        compiler_params=pltpu.CompilerParams(
            dimension_semantics=("parallel",),
            vmem_limit_bytes=32 * 1024 * 1024,
        ),
    )(shift, x2)
    return out2.reshape(B, C, T)


if __name__ == "__main__":
    key = jax.random.PRNGKey(0)
    kx, ks = jax.random.split(key)
    B, C, T = 2, 4, 128
    x = jax.random.normal(kx, (B, C, T), dtype=jnp.float32)

    # random.randrange(-2, 2) equivalent, made deterministic via PRNGKey(0).
    # TODO(synk): host-side Python RNG has no in-kernel equivalent; the roll amount
    # is drawn with jax.random and passed in as a scalar.
    roll_amount = jax.random.randint(ks, (), RANGE[0], RANGE[1], dtype=jnp.int32)

    out = jax.block_until_ready(phase_shuffle(x, roll_amount))

    # Cross-check against the reference semantics (torch.roll == jnp.roll).
    ref = jnp.roll(x, int(roll_amount), axis=-1)
    assert out.shape == x.shape and out.dtype == x.dtype
    assert jnp.array_equal(out, ref)
    print("KERNEL_OK")
</pallas_src>

<mosaic_0001>
module attributes {stable_mosaic.version = 11 : i64} {
  func.func @phase_shuffle_kernel(%arg0: i32, %arg1: memref<1xi32, #tpu.memory_space<smem>>, %arg2: memref<8x128xf32, #tpu.memory_space<vmem>>, %arg3: memref<8x128xf32, #tpu.memory_space<vmem>>) attributes {dimension_semantics = [#tpu.dimension_semantics<parallel>], iteration_bounds = array<i64: 1>, scalar_prefetch = 1 : i64, scratch_operands = 0 : i64, tpu.core_type = #tpu.core_type<tc>, window_params = [{transform_indices = @transform_0, window_bounds = array<i64: 8, 128>}, {transform_indices = @transform_1, window_bounds = array<i64: 8, 128>}]} {
    %c0 = arith.constant 0 : index
    %0 = memref.load %arg1[%c0] : memref<1xi32, #tpu.memory_space<smem>>
    %c0_0 = arith.constant 0 : index
    %c0_1 = arith.constant 0 : index
    %1 = vector.load %arg2[%c0_0, %c0_1] : memref<8x128xf32, #tpu.memory_space<vmem>>, vector<8x128xf32>
    %c-2_i32 = arith.constant -2 : i32
    %2 = arith.cmpi eq, %0, %c-2_i32 : i32
    %c126_i32 = arith.constant 126 : i32
    %3 = tpu.dynamic_rotate %1 by %c126_i32 dim 1 : vector<8x128xf32>, i32 -> vector<8x128xf32>
    %4 = arith.select %2, %3, %1 : vector<8x128xf32>
    %c-1_i32 = arith.constant -1 : i32
    %5 = arith.cmpi eq, %0, %c-1_i32 : i32
    %c127_i32 = arith.constant 127 : i32
    %6 = tpu.dynamic_rotate %1 by %c127_i32 dim 1 : vector<8x128xf32>, i32 -> vector<8x128xf32>
    %7 = arith.select %5, %6, %4 : vector<8x128xf32>
    %c1_i32 = arith.constant 1 : i32
    %8 = arith.cmpi eq, %0, %c1_i32 : i32
    %c1_i32_2 = arith.constant 1 : i32
    %9 = tpu.dynamic_rotate %1 by %c1_i32_2 dim 1 : vector<8x128xf32>, i32 -> vector<8x128xf32>
    %10 = arith.select %8, %9, %7 : vector<8x128xf32>
    %c0_3 = arith.constant 0 : index
    %c0_4 = arith.constant 0 : index
    %11 = vector.load %arg3[%c0_3, %c0_4] : memref<8x128xf32, #tpu.memory_space<vmem>>, vector<8x128xf32>
    tpu.vector_store %arg3[%c0_3, %c0_4], %10 {strides = array<i32>} : memref<8x128xf32, #tpu.memory_space<vmem>>, vector<8x128xf32>,
    return
  }
  func.func @transform_0(%arg0: i32, %arg1: memref<1xi32, #tpu.memory_space<smem>>) -> (i32, i32) {
    %c0_i32 = arith.constant 0 : i32
    %c0_i32_0 = arith.constant 0 : i32
    return %arg0, %c0_i32 : i32, i32
  }
  func.func @transform_1(%arg0: i32, %arg1: memref<1xi32, #tpu.memory_space<smem>>) -> (i32, i32) {
    %c0_i32 = arith.constant 0 : i32
    %c0_i32_0 = arith.constant 0 : i32
    return %arg0, %c0_i32 : i32, i32
  }
}

</mosaic_0001>

<bundles_post_ra>
// kernel: tpu_custom_call.1
= control target key start
LH: loop header
LB: loop body
LE: loop exit
PB: predicated region body
PF: predicated region fallthrough
CT: control target
= control target key end

     0   :  { %8 = vsyncpa [#allocation5], 0  ;;  %s146_s0 = inlined_call_operand.<no memory space> [shape: s32[1], index: 0, kind: input, shape index: {}]   ;;  %s147_s1 = inlined_call_operand.hbm [shape: f32[8,128], index: 1, kind: input, shape index: {}]   ;;  %s148_s2 = inlined_call_operand.hbm [shape: f32[8,128], index: 2, kind: output, shape index: {}]  }
   0x1   :  { %9 = vsyncpa [#allocation6], 0  ;;  %s111_s9 = smov [#allocation4]  }
   0x2   :  { %s16_s10 = sshll.u32 %s111_s9, 4  ;;  %s17_s10 = int_to_ptr.vmem [resolvable:$true] %s16_s10 }
   0x3   :  { %s75_s11 = scalar_lea.vmem %s17_s10, 128  ;;  %p80_p1 = scmp.lt.s32.totalorder %s17_s10, %s17_s10 }
   0x4   :  { %p76_p0 = scmp.ne.s32.totalorder %s17_s10, %s75_s11  ;;  %p81_p2 = scmp.lt.s32.totalorder %s75_s11, %s75_s11 }
   0x6   :  { %p82_p3 = por %p81_p2, %p80_p1 }
   0x8   :  { %p83_p4 = pnand %p82_p3, %p76_p0 }
   0xa   :  { %86 = shalt.err (!%p83_p4)
}
   0xb   :  { %19 = dma.hbm_to_vmem [thread:$0]  %s147_s1, 128, %s17_s10, [#allocation5]  }
   0xc   :  { %107 = dma.done.wait [#allocation5], 128  }
   0xd   :  { %108 = vsyncadd [#allocation5], 4294967168  ;;  %v24_v0 = vld [vmem:[#allocation4] sm:$0xff]  ;;  %s112_s14 = smov 126   ;;  %s113_s15 = smov 1  }
   0xe   :  { %26 = vrot.lane.b32.xlu0 %v24_v0, %s112_s14  ;;  %40 = vrot.lane.b32.xlu1 %v24_v0, %s113_s15  ;;  %s114_s16 = smov 127   ;;  %p25_p5 = scmp.eq.s32.totalorder %s146_s0, 4294967294 }
   0xf   :  { %p32_p6 = scmp.eq.s32.totalorder %s146_s0, 4294967295  ;;  %p39_p7 = scmp.eq.s32.totalorder %s146_s0, 1 }
  0x10   :  { %s28_s1 = scalar_select %p25_p5, 1, 0 }
  0x11   :  { %s35_s23 = scalar_select %p32_p6, 1, 0 }
  0x12   :  { %33 = vrot.lane.b32.xlu0 %v24_v0, %s114_s16  ;;  %s42_s24 = scalar_select %p39_p7, 1, 0  ;;  %v29_v1 = vstv %s28_s1 }
  0x13   :  { %v36_v2 = vstv %s35_s23  ;;  %vm30_vm0 = vcmp.eq.s32.totalorder %v29_v1, 1  ;;  %s115_s25 = smov [#allocation7]  }
  0x14   :  { %v43_v4 = vstv %s42_s24  ;;  %vm37_vm1 = vcmp.eq.s32.totalorder %v36_v2, 1  ;;  %s53_s26 = sshll.u32 %s115_s25, 4  ;;  %s54_s26 = int_to_ptr.vmem [resolvable:$true] %s53_s26 }
  0x15   :  { %vm44_vm2 = vcmp.eq.s32.totalorder %v43_v4, 1  ;;  %s87_s0 = scalar_lea.vmem %s54_s26, 128  ;;  %p92_p9 = scmp.lt.s32.totalorder %s54_s26, %s54_s26 }
  0x16   :  { %p88_p8 = scmp.ne.s32.totalorder %s54_s26, %s87_s0  ;;  %p93_p10 = scmp.lt.s32.totalorder %s87_s0, %s87_s0 }
  0x18   :  { %p94_p11 = por %p93_p10, %p92_p9 }
  0x1a   :  { %p95_p12 = pnand %p94_p11, %p88_p8 }
  0x80   :  { %v27_v3 = vpop.permute.xlu0 %26  ;;  %v41_v5 = vpop.permute.xlu1 %40 }
  0x81   :  { %v31_v6 = vsel %vm30_vm0, %v27_v3, %v24_v0 }
  0x84   :  { %v34_v7 = vpop.permute.xlu0 %33 }
  0x85   :  { %v38_v8 = vsel %vm37_vm1, %v34_v7, %v31_v6 }
  0x86   :  { %v45_v9 = vsel %vm44_vm2, %v41_v5, %v38_v8 }
  0x87   :  { %46 = vst [vmem:[#allocation7] sm:$0xff] %v45_v9 }
  0x88   :  { %98 = shalt.err (!%p95_p12)
}
  0x89   :  { %56 = dma.vmem_to_hbm [thread:$0]  %s54_s26, 128, %s148_s2, [#allocation6]  }
  0x8a   :  { %109 = dma.done.wait [#allocation6], 128  }
  0x8b   :  { %110 = vsyncadd [#allocation6], 4294967168 }
  0x8c   :  { %60 = vsyncpa [#allocation5], 1 }
  0x8d   :  { %61 = vsyncpa [#allocation6], 1 }

</bundles_post_ra>
